<compile_context>
chip_gen: v7x
topology: tpu7x:2x2x1
jax: 0.10.0
libtpu: 0.0.40
codegen_flags: <defaults>
</compile_context>

<pallas_src>
import jax
import jax.numpy as jnp
from jax import lax
from jax.experimental import pallas as pl
from jax.experimental.pallas import tpu as pltpu


def lstm_fc_kernel(x_ref, wih_ref, whh_ref, b_ref, wfc_ref, bfc_ref, out_ref):
    TB, _ = x_ref.shape              # (T*B, D), time-major rows
    B = out_ref.shape[0]
    T = TB // B
    H = whh_ref.shape[0]             # hidden size (W_hh^T is (H, 4H))

    # 1) Hoisted input projection: one MXU matmul for all timesteps + fused bias.
    #    (T*B, D) @ (D, 4H) -> (T*B, 4H)
    xw = jnp.dot(x_ref[...], wih_ref[...],
                 preferred_element_type=jnp.float32) + b_ref[...]

    # 2) Recurrence, fully unrolled (T is a static trace-time constant), so the
    #    whole sequence is one straight-line region with static slices; h/c
    #    stay in vregs.
    h = jnp.zeros((B, H), jnp.float32)
    c = jnp.zeros((B, H), jnp.float32)
    for t in range(T):
        gates = xw[t * B:(t + 1) * B, :] + jnp.dot(
            h, whh_ref[...], preferred_element_type=jnp.float32)   # (B, 4H)
        # Two full-width (4H-lane) EUP passes instead of four sub-width ones.
        sig = jax.nn.sigmoid(gates)      # lanes: [ i | f | . | o ]
        th = jnp.tanh(gates)             # lanes: [ . | . | g | . ]
        i_g = sig[:, 0 * H:1 * H]
        f_g = sig[:, 1 * H:2 * H]
        g_g = th[:, 2 * H:3 * H]
        o_g = sig[:, 3 * H:4 * H]
        c = f_g * c + i_g * g_g
        h = o_g * jnp.tanh(c)

    # 3) Fused final Linear on the last hidden state: (B, H) @ (H, O) + b_fc.
    out_ref[...] = (jnp.dot(h, wfc_ref[...],
                            preferred_element_type=jnp.float32)
                    + bfc_ref[...]).astype(out_ref.dtype)


def lstm_model_forward(x_btd, w_ih, w_hh, b_ih, b_hh, w_fc, b_fc):
    """x_btd: (B, T, D) float32, batch_first like the PyTorch module.

    w_ih: (4H, D), w_hh: (4H, H), b_ih/b_hh: (4H,)  -- PyTorch nn.LSTM layout
    w_fc: (O, H), b_fc: (O,)                        -- PyTorch nn.Linear layout
    Returns: (B, O) float32, same semantics as LSTMModel.forward.

    For best TPU utilization, batch as many sequences as possible into one call
    (B a multiple of 8, ideally >=128); weights stay resident either way.
    """
    B, T, D = x_btd.shape
    H4 = w_ih.shape[0]
    H = H4 // 4
    O = w_fc.shape[0]

    # Layout glue only (transposes / reshape / bias fold); all compute is in-kernel.
    x_flat = jnp.transpose(x_btd, (1, 0, 2)).reshape(T * B, D)     # row t*B+b = x[b, t]
    x_flat = x_flat.astype(jnp.float32)
    wih_t = jnp.transpose(w_ih).astype(jnp.float32)                # (D, 4H)
    whh_t = jnp.transpose(w_hh).astype(jnp.float32)                # (H, 4H)
    bias = (b_ih + b_hh).reshape(1, H4).astype(jnp.float32)        # folded once
    wfc_t = jnp.transpose(w_fc).astype(jnp.float32)                # (H, O)
    bfc = b_fc.reshape(1, O).astype(jnp.float32)

    # Single invocation, everything resident in VMEM (well under any VMEM limit
    # at these sizes, including v7x's 64 MiB). TODO(synk): if H is scaled up,
    # re-derive the resident W_hh budget / tile its 4H axis for v7x.
    return pl.pallas_call(
        lstm_fc_kernel,
        out_shape=jax.ShapeDtypeStruct((B, O), jnp.float32),
        in_specs=[pl.BlockSpec(memory_space=pltpu.MemorySpace.VMEM)] * 6,
        out_specs=pl.BlockSpec(memory_space=pltpu.MemorySpace.VMEM),
    )(x_flat, wih_t, whh_t, bias, wfc_t, bfc)


def lstm_model_reference(x_btd, w_ih, w_hh, b_ih, b_hh, w_fc, b_fc):
    """Pure-JAX reference mirroring torch.nn.LSTM + Linear semantics."""
    B, T, D = x_btd.shape
    H = w_hh.shape[1]
    h = jnp.zeros((B, H), jnp.float32)
    c = jnp.zeros((B, H), jnp.float32)

    def step(carry, x_t):
        h, c = carry
        gates = x_t @ w_ih.T + h @ w_hh.T + b_ih + b_hh
        i = jax.nn.sigmoid(gates[:, 0 * H:1 * H])
        f = jax.nn.sigmoid(gates[:, 1 * H:2 * H])
        g = jnp.tanh(gates[:, 2 * H:3 * H])
        o = jax.nn.sigmoid(gates[:, 3 * H:4 * H])
        c_new = f * c + i * g
        h_new = o * jnp.tanh(c_new)
        return (h_new, c_new), None

    (h, c), _ = lax.scan(step, (h, c), jnp.transpose(x_btd, (1, 0, 2)))
    return h @ w_fc.T + b_fc


if __name__ == "__main__":
    # Small shapes consistent with the module: (n_samples, n_points, dim_X)
    B, T, D = 2, 8, 4          # batch, sequence length, input_channels
    H, O = 32, 3               # hidden_channels, output_dim

    key = jax.random.PRNGKey(0)
    ks = jax.random.split(key, 7)
    bound = 1.0 / jnp.sqrt(H)  # PyTorch default LSTM/Linear init range

    x = jax.random.normal(ks[0], (B, T, D), jnp.float32)
    w_ih = jax.random.uniform(ks[1], (4 * H, D), jnp.float32, -bound, bound)
    w_hh = jax.random.uniform(ks[2], (4 * H, H), jnp.float32, -bound, bound)
    b_ih = jax.random.uniform(ks[3], (4 * H,), jnp.float32, -bound, bound)
    b_hh = jax.random.uniform(ks[4], (4 * H,), jnp.float32, -bound, bound)
    w_fc = jax.random.uniform(ks[5], (O, H), jnp.float32, -bound, bound)
    b_fc = jax.random.uniform(ks[6], (O,), jnp.float32, -bound, bound)

    out = lstm_model_forward(x, w_ih, w_hh, b_ih, b_hh, w_fc, b_fc)
    out = jax.block_until_ready(out)

    ref = lstm_model_reference(x, w_ih, w_hh, b_ih, b_hh, w_fc, b_fc)
    assert out.shape == (B, O)
    assert jnp.allclose(out, ref, atol=1e-5, rtol=1e-5), (out, ref)

    print("KERNEL_OK")
</pallas_src>

<mosaic_0001>
module attributes {stable_mosaic.version = 11 : i64} {
  func.func @lstm_fc_kernel(%arg0: memref<16x4xf32, #tpu.memory_space<vmem>>, %arg1: memref<4x128xf32, #tpu.memory_space<vmem>>, %arg2: memref<32x128xf32, #tpu.memory_space<vmem>>, %arg3: memref<1x128xf32, #tpu.memory_space<vmem>>, %arg4: memref<32x3xf32, #tpu.memory_space<vmem>>, %arg5: memref<1x3xf32, #tpu.memory_space<vmem>>, %arg6: memref<2x3xf32, #tpu.memory_space<vmem>>) attributes {dimension_semantics = [], scalar_prefetch = 0 : i64, scratch_operands = 0 : i64, tpu.core_type = #tpu.core_type<tc>} {
    %c0 = arith.constant 0 : index
    %c0_0 = arith.constant 0 : index
    %0 = vector.load %arg0[%c0, %c0_0] : memref<16x4xf32, #tpu.memory_space<vmem>>, vector<16x4xf32>
    %c0_1 = arith.constant 0 : index
    %c0_2 = arith.constant 0 : index
    %1 = vector.load %arg1[%c0_1, %c0_2] : memref<4x128xf32, #tpu.memory_space<vmem>>, vector<4x128xf32>
    %cst = arith.constant dense<0.000000e+00> : vector<16x128xf32>
    %2 = tpu.matmul %0, %1, %cst {dimension_numbers = #tpu.dot_dimension_numbers<[1], [0], [0], [1], [0, 0, 1, 1], [], []>} : vector<16x4xf32>, vector<4x128xf32>, vector<16x128xf32> -> vector<16x128xf32>
    %c0_3 = arith.constant 0 : index
    %c0_4 = arith.constant 0 : index
    %3 = vector.load %arg3[%c0_3, %c0_4] : memref<1x128xf32, #tpu.memory_space<vmem>>, vector<1x128xf32>
    %4 = vector.broadcast %3 : vector<1x128xf32> to vector<16x128xf32>
    %5 = arith.addf %2, %4 : vector<16x128xf32>
    %cst_5 = arith.constant 0.000000e+00 : f32
    %6 = vector.broadcast %cst_5 : f32 to vector<2x32xf32>
    %cst_6 = arith.constant 0.000000e+00 : f32
    %7 = vector.broadcast %cst_6 : f32 to vector<2x32xf32>
    %8 = vector.extract_strided_slice %5 {offsets = [0, 0], sizes = [2, 128], strides = [1, 1]} : vector<16x128xf32> to vector<2x128xf32>
    %c0_7 = arith.constant 0 : index
    %c0_8 = arith.constant 0 : index
    %9 = vector.load %arg2[%c0_7, %c0_8] : memref<32x128xf32, #tpu.memory_space<vmem>>, vector<32x128xf32>
    %cst_9 = arith.constant dense<0.000000e+00> : vector<2x128xf32>
    %10 = tpu.matmul %6, %9, %cst_9 {dimension_numbers = #tpu.dot_dimension_numbers<[1], [0], [0], [1], [0, 0, 1, 1], [], []>} : vector<2x32xf32>, vector<32x128xf32>, vector<2x128xf32> -> vector<2x128xf32>
    %11 = arith.addf %8, %10 : vector<2x128xf32>
    %12 = arith.negf %11 : vector<2x128xf32>
    %13 = math.exp %12 : vector<2x128xf32>
    %cst_10 = arith.constant 1.000000e+00 : f32
    %14 = vector.broadcast %cst_10 : f32 to vector<2x128xf32>
    %15 = arith.addf %14, %13 : vector<2x128xf32>
    %16 = arith.divf %14, %15 : vector<2x128xf32>
    %17 = math.tanh %11 : vector<2x128xf32>
    %18 = vector.extract_strided_slice %16 {offsets = [0, 0], sizes = [2, 32], strides = [1, 1]} : vector<2x128xf32> to vector<2x32xf32>
    %19 = vector.extract_strided_slice %16 {offsets = [0, 32], sizes = [2, 32], strides = [1, 1]} : vector<2x128xf32> to vector<2x32xf32>
    %20 = vector.extract_strided_slice %17 {offsets = [0, 64], sizes = [2, 32], strides = [1, 1]} : vector<2x128xf32> to vector<2x32xf32>
    %21 = vector.extract_strided_slice %16 {offsets = [0, 96], sizes = [2, 32], strides = [1, 1]} : vector<2x128xf32> to vector<2x32xf32>
    %22 = arith.mulf %19, %7 : vector<2x32xf32>
    %23 = arith.mulf %18, %20 : vector<2x32xf32>
    %24 = arith.addf %22, %23 : vector<2x32xf32>
    %25 = math.tanh %24 : vector<2x32xf32>
    %26 = arith.mulf %21, %25 : vector<2x32xf32>
    %27 = vector.extract_strided_slice %5 {offsets = [2, 0], sizes = [2, 128], strides = [1, 1]} : vector<16x128xf32> to vector<2x128xf32>
    %c0_11 = arith.constant 0 : index
    %c0_12 = arith.constant 0 : index
    %28 = vector.load %arg2[%c0_11, %c0_12] : memref<32x128xf32, #tpu.memory_space<vmem>>, vector<32x128xf32>
    %cst_13 = arith.constant dense<0.000000e+00> : vector<2x128xf32>
    %29 = tpu.matmul %26, %28, %cst_13 {dimension_numbers = #tpu.dot_dimension_numbers<[1], [0], [0], [1], [0, 0, 1, 1], [], []>} : vector<2x32xf32>, vector<32x128xf32>, vector<2x128xf32> -> vector<2x128xf32>
    %30 = arith.addf %27, %29 : vector<2x128xf32>
    %31 = arith.negf %30 : vector<2x128xf32>
    %32 = math.exp %31 : vector<2x128xf32>
    %cst_14 = arith.constant 1.000000e+00 : f32
    %33 = vector.broadcast %cst_14 : f32 to vector<2x128xf32>
    %34 = arith.addf %33, %32 : vector<2x128xf32>
    %35 = arith.divf %33, %34 : vector<2x128xf32>
    %36 = math.tanh %30 : vector<2x128xf32>
    %37 = vector.extract_strided_slice %35 {offsets = [0, 0], sizes = [2, 32], strides = [1, 1]} : vector<2x128xf32> to vector<2x32xf32>
    %38 = vector.extract_strided_slice %35 {offsets = [0, 32], sizes = [2, 32], strides = [1, 1]} : vector<2x128xf32> to vector<2x32xf32>
    %39 = vector.extract_strided_slice %36 {offsets = [0, 64], sizes = [2, 32], strides = [1, 1]} : vector<2x128xf32> to vector<2x32xf32>
    %40 = vector.extract_strided_slice %35 {offsets = [0, 96], sizes = [2, 32], strides = [1, 1]} : vector<2x128xf32> to vector<2x32xf32>
    %41 = arith.mulf %38, %24 : vector<2x32xf32>
    %42 = arith.mulf %37, %39 : vector<2x32xf32>
    %43 = arith.addf %41, %42 : vector<2x32xf32>
    %44 = math.tanh %43 : vector<2x32xf32>
    %45 = arith.mulf %40, %44 : vector<2x32xf32>
    %46 = vector.extract_strided_slice %5 {offsets = [4, 0], sizes = [2, 128], strides = [1, 1]} : vector<16x128xf32> to vector<2x128xf32>
    %c0_15 = arith.constant 0 : index
    %c0_16 = arith.constant 0 : index
    %47 = vector.load %arg2[%c0_15, %c0_16] : memref<32x128xf32, #tpu.memory_space<vmem>>, vector<32x128xf32>
    %cst_17 = arith.constant dense<0.000000e+00> : vector<2x128xf32>
    %48 = tpu.matmul %45, %47, %cst_17 {dimension_numbers = #tpu.dot_dimension_numbers<[1], [0], [0], [1], [0, 0, 1, 1], [], []>} : vector<2x32xf32>, vector<32x128xf32>, vector<2x128xf32> -> vector<2x128xf32>
    %49 = arith.addf %46, %48 : vector<2x128xf32>
    %50 = arith.negf %49 : vector<2x128xf32>
    %51 = math.exp %50 : vector<2x128xf32>
    %cst_18 = arith.constant 1.000000e+00 : f32
    %52 = vector.broadcast %cst_18 : f32 to vector<2x128xf32>
    %53 = arith.addf %52, %51 : vector<2x128xf32>
    %54 = arith.divf %52, %53 : vector<2x128xf32>
    %55 = math.tanh %49 : vector<2x128xf32>
    %56 = vector.extract_strided_slice %54 {offsets = [0, 0], sizes = [2, 32], strides = [1, 1]} : vector<2x128xf32> to vector<2x32xf32>
    %57 = vector.extract_strided_slice %54 {offsets = [0, 32], sizes = [2, 32], strides = [1, 1]} : vector<2x128xf32> to vector<2x32xf32>
    %58 = vector.extract_strided_slice %55 {offsets = [0, 64], sizes = [2, 32], strides = [1, 1]} : vector<2x128xf32> to vector<2x32xf32>
    %59 = vector.extract_strided_slice %54 {offsets = [0, 96], sizes = [2, 32], strides = [1, 1]} : vector<2x128xf32> to vector<2x32xf32>
    %60 = arith.mulf %57, %43 : vector<2x32xf32>
    %61 = arith.mulf %56, %58 : vector<2x32xf32>
    %62 = arith.addf %60, %61 : vector<2x32xf32>
    %63 = math.tanh %62 : vector<2x32xf32>
    %64 = arith.mulf %59, %63 : vector<2x32xf32>
    %65 = vector.extract_strided_slice %5 {offsets = [6, 0], sizes = [2, 128], strides = [1, 1]} : vector<16x128xf32> to vector<2x128xf32>
    %c0_19 = arith.constant 0 : index
    %c0_20 = arith.constant 0 : index
    %66 = vector.load %arg2[%c0_19, %c0_20] : memref<32x128xf32, #tpu.memory_space<vmem>>, vector<32x128xf32>
    %cst_21 = arith.constant dense<0.000000e+00> : vector<2x128xf32>
    %67 = tpu.matmul %64, %66, %cst_21 {dimension_numbers = #tpu.dot_dimension_numbers<[1], [0], [0], [1], [0, 0, 1, 1], [], []>} : vector<2x32xf32>, vector<32x128xf32>, vector<2x128xf32> -> vector<2x128xf32>
    %68 = arith.addf %65, %67 : vector<2x128xf32>
    %69 = arith.negf %68 : vector<2x128xf32>
    %70 = math.exp %69 : vector<2x128xf32>
    %cst_22 = arith.constant 1.000000e+00 : f32
    %71 = vector.broadcast %cst_22 : f32 to vector<2x128xf32>
    %72 = arith.addf %71, %70 : vector<2x128xf32>
    %73 = arith.divf %71, %72 : vector<2x128xf32>
    %74 = math.tanh %68 : vector<2x128xf32>
    %75 = vector.extract_strided_slice %73 {offsets = [0, 0], sizes = [2, 32], strides = [1, 1]} : vector<2x128xf32> to vector<2x32xf32>
    %76 = vector.extract_strided_slice %73 {offsets = [0, 32], sizes = [2, 32], strides = [1, 1]} : vector<2x128xf32> to vector<2x32xf32>
    %77 = vector.extract_strided_slice %74 {offsets = [0, 64], sizes = [2, 32], strides = [1, 1]} : vector<2x128xf32> to vector<2x32xf32>
    %78 = vector.extract_strided_slice %73 {offsets = [0, 96], sizes = [2, 32], strides = [1, 1]} : vector<2x128xf32> to vector<2x32xf32>
    %79 = arith.mulf %76, %62 : vector<2x32xf32>
    %80 = arith.mulf %75, %77 : vector<2x32xf32>
    %81 = arith.addf %79, %80 : vector<2x32xf32>
    %82 = math.tanh %81 : vector<2x32xf32>
    %83 = arith.mulf %78, %82 : vector<2x32xf32>
    %84 = vector.extract_strided_slice %5 {offsets = [8, 0], sizes = [2, 128], strides = [1, 1]} : vector<16x128xf32> to vector<2x128xf32>
    %c0_23 = arith.constant 0 : index
    %c0_24 = arith.constant 0 : index
    %85 = vector.load %arg2[%c0_23, %c0_24] : memref<32x128xf32, #tpu.memory_space<vmem>>, vector<32x128xf32>
    %cst_25 = arith.constant dense<0.000000e+00> : vector<2x128xf32>
    %86 = tpu.matmul %83, %85, %cst_25 {dimension_numbers = #tpu.dot_dimension_numbers<[1], [0], [0], [1], [0, 0, 1, 1], [], []>} : vector<2x32xf32>, vector<32x128xf32>, vector<2x128xf32> -> vector<2x128xf32>
    %87 = arith.addf %84, %86 : vector<2x128xf32>
    %88 = arith.negf %87 : vector<2x128xf32>
    %89 = math.exp %88 : vector<2x128xf32>
    %cst_26 = arith.constant 1.000000e+00 : f32
    %90 = vector.broadcast %cst_26 : f32 to vector<2x128xf32>
    %91 = arith.addf %90, %89 : vector<2x128xf32>
    %92 = arith.divf %90, %91 : vector<2x128xf32>
    %93 = math.tanh %87 : vector<2x128xf32>
    %94 = vector.extract_strided_slice %92 {offsets = [0, 0], sizes = [2, 32], strides = [1, 1]} : vector<2x128xf32> to vector<2x32xf32>
    %95 = vector.extract_strided_slice %92 {offsets = [0, 32], sizes = [2, 32], strides = [1, 1]} : vector<2x128xf32> to vector<2x32xf32>
    %96 = vector.extract_strided_slice %93 {offsets = [0, 64], sizes = [2, 32], strides = [1, 1]} : vector<2x128xf32> to vector<2x32xf32>
    %97 = vector.extract_strided_slice %92 {offsets = [0, 96], sizes = [2, 32], strides = [1, 1]} : vector<2x128xf32> to vector<2x32xf32>
    %98 = arith.mulf %95, %81 : vector<2x32xf32>
    %99 = arith.mulf %94, %96 : vector<2x32xf32>
    %100 = arith.addf %98, %99 : vector<2x32xf32>
    %101 = math.tanh %100 : vector<2x32xf32>
    %102 = arith.mulf %97, %101 : vector<2x32xf32>
    %103 = vector.extract_strided_slice %5 {offsets = [10, 0], sizes = [2, 128], strides = [1, 1]} : vector<16x128xf32> to vector<2x128xf32>
    %c0_27 = arith.constant 0 : index
    %c0_28 = arith.constant 0 : index
    %104 = vector.load %arg2[%c0_27, %c0_28] : memref<32x128xf32, #tpu.memory_space<vmem>>, vector<32x128xf32>
    %cst_29 = arith.constant dense<0.000000e+00> : vector<2x128xf32>
    %105 = tpu.matmul %102, %104, %cst_29 {dimension_numbers = #tpu.dot_dimension_numbers<[1], [0], [0], [1], [0, 0, 1, 1], [], []>} : vector<2x32xf32>, vector<32x128xf32>, vector<2x128xf32> -> vector<2x128xf32>
    %106 = arith.addf %103, %105 : vector<2x128xf32>
    %107 = arith.negf %106 : vector<2x128xf32>
    %108 = math.exp %107 : vector<2x128xf32>
    %cst_30 = arith.constant 1.000000e+00 : f32
    %109 = vector.broadcast %cst_30 : f32 to vector<2x128xf32>
    %110 = arith.addf %109, %108 : vector<2x128xf32>
    %111 = arith.divf %109, %110 : vector<2x128xf32>
    %112 = math.tanh %106 : vector<2x128xf32>
    %113 = vector.extract_strided_slice %111 {offsets = [0, 0], sizes = [2, 32], strides = [1, 1]} : vector<2x128xf32> to vector<2x32xf32>
    %114 = vector.extract_strided_slice %111 {offsets = [0, 32], sizes = [2, 32], strides = [1, 1]} : vector<2x128xf32> to vector<2x32xf32>
    %115 = vector.extract_strided_slice %112 {offsets = [0, 64], sizes = [2, 32], strides = [1, 1]} : vector<2x128xf32> to vector<2x32xf32>
    %116 = vector.extract_strided_slice %111 {offsets = [0, 96], sizes = [2, 32], strides = [1, 1]} : vector<2x128xf32> to vector<2x32xf32>
    %117 = arith.mulf %114, %100 : vector<2x32xf32>
    %118 = arith.mulf %113, %115 : vector<2x32xf32>
    %119 = arith.addf %117, %118 : vector<2x32xf32>
    %120 = math.tanh %119 : vector<2x32xf32>
    %121 = arith.mulf %116, %120 : vector<2x32xf32>
    %122 = vector.extract_strided_slice %5 {offsets = [12, 0], sizes = [2, 128], strides = [1, 1]} : vector<16x128xf32> to vector<2x128xf32>
    %c0_31 = arith.constant 0 : index
    %c0_32 = arith.constant 0 : index
    %123 = vector.load %arg2[%c0_31, %c0_32] : memref<32x128xf32, #tpu.memory_space<vmem>>, vector<32x128xf32>
    %cst_33 = arith.constant dense<0.000000e+00> : vector<2x128xf32>
    %124 = tpu.matmul %121, %123, %cst_33 {dimension_numbers = #tpu.dot_dimension_numbers<[1], [0], [0], [1], [0, 0, 1, 1], [], []>} : vector<2x32xf32>, vector<32x128xf32>, vector<2x128xf32> -> vector<2x128xf32>
    %125 = arith.addf %122, %124 : vector<2x128xf32>
    %126 = arith.negf %125 : vector<2x128xf32>
    %127 = math.exp %126 : vector<2x128xf32>
    %cst_34 = arith.constant 1.000000e+00 : f32
    %128 = vector.broadcast %cst_34 : f32 to vector<2x128xf32>
    %129 = arith.addf %128, %127 : vector<2x128xf32>
    %130 = arith.divf %128, %129 : vector<2x128xf32>
    %131 = math.tanh %125 : vector<2x128xf32>
    %132 = vector.extract_strided_slice %130 {offsets = [0, 0], sizes = [2, 32], strides = [1, 1]} : vector<2x128xf32> to vector<2x32xf32>
    %133 = vector.extract_strided_slice %130 {offsets = [0, 32], sizes = [2, 32], strides = [1, 1]} : vector<2x128xf32> to vector<2x32xf32>
    %134 = vector.extract_strided_slice %131 {offsets = [0, 64], sizes = [2, 32], strides = [1, 1]} : vector<2x128xf32> to vector<2x32xf32>
    %135 = vector.extract_strided_slice %130 {offsets = [0, 96], sizes = [2, 32], strides = [1, 1]} : vector<2x128xf32> to vector<2x32xf32>
    %136 = arith.mulf %133, %119 : vector<2x32xf32>
    %137 = arith.mulf %132, %134 : vector<2x32xf32>
    %138 = arith.addf %136, %137 : vector<2x32xf32>
    %139 = math.tanh %138 : vector<2x32xf32>
    %140 = arith.mulf %135, %139 : vector<2x32xf32>
    %141 = vector.extract_strided_slice %5 {offsets = [14, 0], sizes = [2, 128], strides = [1, 1]} : vector<16x128xf32> to vector<2x128xf32>
    %c0_35 = arith.constant 0 : index
    %c0_36 = arith.constant 0 : index
    %142 = vector.load %arg2[%c0_35, %c0_36] : memref<32x128xf32, #tpu.memory_space<vmem>>, vector<32x128xf32>
    %cst_37 = arith.constant dense<0.000000e+00> : vector<2x128xf32>
    %143 = tpu.matmul %140, %142, %cst_37 {dimension_numbers = #tpu.dot_dimension_numbers<[1], [0], [0], [1], [0, 0, 1, 1], [], []>} : vector<2x32xf32>, vector<32x128xf32>, vector<2x128xf32> -> vector<2x128xf32>
    %144 = arith.addf %141, %143 : vector<2x128xf32>
    %145 = arith.negf %144 : vector<2x128xf32>
    %146 = math.exp %145 : vector<2x128xf32>
    %cst_38 = arith.constant 1.000000e+00 : f32
    %147 = vector.broadcast %cst_38 : f32 to vector<2x128xf32>
    %148 = arith.addf %147, %146 : vector<2x128xf32>
    %149 = arith.divf %147, %148 : vector<2x128xf32>
    %150 = math.tanh %144 : vector<2x128xf32>
    %151 = vector.extract_strided_slice %149 {offsets = [0, 0], sizes = [2, 32], strides = [1, 1]} : vector<2x128xf32> to vector<2x32xf32>
    %152 = vector.extract_strided_slice %149 {offsets = [0, 32], sizes = [2, 32], strides = [1, 1]} : vector<2x128xf32> to vector<2x32xf32>
    %153 = vector.extract_strided_slice %150 {offsets = [0, 64], sizes = [2, 32], strides = [1, 1]} : vector<2x128xf32> to vector<2x32xf32>
    %154 = vector.extract_strided_slice %149 {offsets = [0, 96], sizes = [2, 32], strides = [1, 1]} : vector<2x128xf32> to vector<2x32xf32>
    %155 = arith.mulf %152, %138 : vector<2x32xf32>
    %156 = arith.mulf %151, %153 : vector<2x32xf32>
    %157 = arith.addf %155, %156 : vector<2x32xf32>
    %158 = math.tanh %157 : vector<2x32xf32>
    %159 = arith.mulf %154, %158 : vector<2x32xf32>
    %c0_39 = arith.constant 0 : index
    %c0_40 = arith.constant 0 : index
    %160 = vector.load %arg4[%c0_39, %c0_40] : memref<32x3xf32, #tpu.memory_space<vmem>>, vector<32x3xf32>
    %cst_41 = arith.constant dense<0.000000e+00> : vector<2x3xf32>
    %161 = tpu.matmul %159, %160, %cst_41 {dimension_numbers = #tpu.dot_dimension_numbers<[1], [0], [0], [1], [0, 0, 1, 1], [], []>} : vector<2x32xf32>, vector<32x3xf32>, vector<2x3xf32> -> vector<2x3xf32>
    %c0_42 = arith.constant 0 : index
    %c0_43 = arith.constant 0 : index
    %162 = vector.load %arg5[%c0_42, %c0_43] : memref<1x3xf32, #tpu.memory_space<vmem>>, vector<1x3xf32>
    %163 = vector.broadcast %162 : vector<1x3xf32> to vector<2x3xf32>
    %164 = arith.addf %161, %163 : vector<2x3xf32>
    %c0_44 = arith.constant 0 : index
    %c0_45 = arith.constant 0 : index
    %165 = vector.load %arg6[%c0_44, %c0_45] : memref<2x3xf32, #tpu.memory_space<vmem>>, vector<2x3xf32>
    tpu.vector_store %arg6[%c0_44, %c0_45], %164 {strides = array<i32>} : memref<2x3xf32, #tpu.memory_space<vmem>>, vector<2x3xf32>,
    return
  }
}

</mosaic_0001>

<bundles_post_ra>
// kernel: tpu_custom_call.1
= control target key start
LH: loop header
LB: loop body
LE: loop exit
PB: predicated region body
PF: predicated region fallthrough
CT: control target
= control target key end

     0   :  { %vm41_vm0 = vcmask 1043456   ;;  %v1391_v3 = vmov 0.0|0.0   ;;  %vm34_vm1 = vcmask 31744   ;;  %s1592_s0 = inlined_call_operand.vmem [shape: f32[16,4], index: 0, kind: input, shape index: {}]   ;;  %s1593_s1 = inlined_call_operand.vmem [shape: f32[4,128], index: 1, kind: input, shape index: {}]   ;;  %s1594_s2 = inlined_call_operand.vmem [shape: f32[32,128], index: 2, kind: input, shape index: {}]   ;;  %s1595_s3 = inlined_call_operand.vmem [shape: f32[1,128], index: 3, kind: input, shape index: {}]   ;;  %s1596_s4 = inlined_call_operand.vmem [shape: f32[32,3], index: 4, kind: input, shape index: {}]   ;;  %s1597_s5 = inlined_call_operand.vmem [shape: f32[1,3], index: 5, kind: input, shape index: {}]   ;;  %s1598_s6 = inlined_call_operand.hbm [shape: f32[2,3], index: 6, kind: output, shape index: {}]  }
   0x1   :  { %v120_v0 = vld [vmem:[%s1594_s2] sm:$0xff]  ;;  %v121_v1 = vld [vmem:[%s1594_s2 + $0x8] sm:$0xff]  ;;  %1243 = vmatprep.subr.bf16.mxu1 %v1391_v3  ;;  %v122_v7 = vld [vmem:[%s1594_s2 + $0x10] sm:$0xff] }
   0x2   :  { %v26_v2 = vld [vmem:[%s1593_s1] sm:$0xf]  ;;  %v1442_v4 = vpack.c.bf16 %v121_v1, %v120_v0  ;;  %v25_v6 = vld [vmem:[%s1592_s0 + $0x8] sm:$0xff]  ;;  %v123_v8 = vld [vmem:[%s1594_s2 + $0x18] sm:$0xff] }
   0x3   :  { %1139 = vmatprep.subr.msk.mxu0 %vm41_vm0, %v26_v2  ;;  %v24_v5 = vld [vmem:[%s1592_s0] sm:$0xff] }
   0x4   :  { %1140 = vmatpush3.msk.msra.mxu0 %vm41_vm0, %v26_v2  ;;  %1141 = vmatprep.mubr.msk.f32.mxu0 %vm34_vm1, %v24_v5 }
   0x5   :  { %11 = vsyncpa [#allocation3], 0  ;;  %1245 = vmatpush3.bf16.msra.mxu1 %v1442_v4  ;;  %1142 = vmatmul.mubr.msk.f32.vlgmr.msra.gmra.mrb[0].mxu0 %vm34_vm1, %v25_v6  ;;  %v1457_v9 = vpack.c.bf16 %v123_v8, %v122_v7  ;;  %vm1392_vm2 = vmmov 0   ;;  %v1393_v10 = vmov 0.0   ;;  %v1070_v11 = vld [vmem:[%s1595_s3] ss:$0 sm:$0xff] }
   0x6   :  { %1246 = vmatprep.subr.bf16.mxu1 %v1391_v3  ;;  %1152 = vmatprep.mubr.msk.f32.mxu1 %vm1392_vm2, %v1393_v10  ;;  %s1394_s10 = smov 64   ;;  %s1395_s3 = smov 32   ;;  %vm124_vm3 = vcmask 261120   ;;  %vm1054_vm4 = vcmask 17408  }
   0x7   :  { %1249 = vmatprep.subr.bf16.mxu0 %v1391_v3  ;;  %1163 = vmatprep.mubr.msk.f32.mxu0 %vm1392_vm2, %v1393_v10 }
   0x8   :  { %1251 = vmatpush3.bf16.msra.mxu0 %v1442_v4 }
   0x9   :  { %1248 = vmatpush3.bf16.msra.mxu1 %v1457_v9  ;;  %1252 = vmatprep.subr.bf16.mxu0 %v1391_v3 }
   0xa   :  { %1255 = vmatprep.subr.bf16.mxu1 %v1391_v3 }
   0xc   :  { %1153 = vmatmul.mubr.f32.vlgmr.msra.gmra.mrb[0].mxu1 %v1393_v10  ;;  %1254 = vmatpush3.bf16.msra.mxu0 %v1457_v9 }
   0xd   :  { %1257 = vmatpush3.bf16.msra.mxu1 %v1442_v4  ;;  %1174 = vmatprep.mubr.msk.f32.mxu1 %vm1392_vm2, %v1393_v10 }
   0xe   :  { %1258 = vmatprep.subr.bf16.mxu1 %v1391_v3  ;;  %1261 = vmatprep.subr.bf16.mxu0 %v1391_v3 }
  0x11   :  { %1260 = vmatpush3.bf16.msra.mxu1 %v1457_v9 }
  0x12   :  { %1267 = vmatprep.subr.bf16.mxu1 %v1391_v3 }
  0xd8   :  { %v1143_v12 = vpop.f32.mrb[0].mxu0 }
  0xd9   :  { %v1481_v13 = vadd.f32 %v1143_v12, %v1070_v11  ;;  %v111_v14 = vpop.f32.mrb[1].mxu0 }
  0xda   :  { %v1483_v15 = vadd.f32 %v1070_v11, %v111_v14 }
  0xdf   :  { %v194_v16 = vpop.f32.mrb[0].mxu1 }
  0xe0   :  { %v198_v17 = vadd.f32 %v194_v16, %v1483_v15  ;;  %v1154_v18 = vpop.f32.mrb[1].mxu1 }
  0xe2   :  { %1303 = vtanh.f32 %v198_v17  ;;  %v1074_v20 = vmul.f32 -1.442695, %v198_v17 }
  0xe4   :  { %1305 = vpow2.f32 %v1074_v20 }
  0xec   :  { %v1304_v19 = vpop.eup %1303 }
  0xed   :  { %208 = vrot.lane.b32.xlu0 %v1304_v19, %s1394_s10 }
  0xee   :  { %v1306_v21 = vpop.eup %1305 }
  0xef   :  { %v202_v22 = vadd.f32 1.0, %v1306_v21 }
  0xf1   :  { %1307 = vrcp.f32 %v202_v22 }
  0xfb   :  { %v1308_v23 = vpop.eup %1307 }
  0xfc   :  { %v206_v26 = vmul.f32 0.0, %v1308_v23 }
 0x15f   :  { %v209_v24 = vpop.permute.xlu0 %208 }
 0x160   :  { %v211_v25 = vmul.f32 %v1308_v23, %v209_v24 }
 0x162   :  { %213 = vrot.lane.b32.xlu0 %v211_v25, %s1395_s3 }
 0x1d4   :  { %v214_v27 = vpop.permute.xlu0 %213 }
 0x1d5   :  { %v216_v28 = vadd.f32 %v214_v27, %v206_v26 }
 0x1d7   :  { %1309 = vtanh.f32 %v216_v28  ;;  %v310_v44 = vrot.slane %v216_v28, 6 }
 0x1e1   :  { %v1310_v29 = vpop.eup %1309 }
 0x1e2   :  { %219 = vrot.lane.b32.xlu1 %v1310_v29, %s1394_s10 }
 0x254   :  { %v220_v30 = vpop.permute.xlu1 %219 }
 0x255   :  { %v222_v31 = vmul.f32 %v1308_v23, %v220_v30 }
 0x257   :  { %224 = vrot.lane.b32.xlu1 %v222_v31, %s1395_s3 }
 0x2c9   :  { %v225_v32 = vpop.permute.xlu1 %224 }
 0x2ca   :  { %1164 = vmatmul.mubr.msk.f32.vlgmr.msra.gmra.mrb[2].mxu0 %vm124_vm3, %v225_v32 }
 0x2cb   :  { %1263 = vmatpush3.bf16.msra.mxu0 %v1442_v4  ;;  %1185 = vmatprep.mubr.msk.f32.mxu0 %vm1392_vm2, %v1393_v10 }
 0x2cc   :  { %1264 = vmatprep.subr.bf16.mxu0 %v1391_v3 }
 0x2cf   :  { %1266 = vmatpush3.bf16.msra.mxu0 %v1457_v9 }
 0x2d0   :  { %1273 = vmatprep.subr.bf16.mxu0 %v1391_v3 }
 0x39d   :  { %v294_v33 = vpop.f32.mrb[2].mxu0 }
 0x39e   :  { %v299_v34 = vrot.slane %v294_v33, 6  ;;  %v1165_v35 = vpop.f32.mrb[3].mxu0 }
 0x3a0   :  { %v301_v36 = vadd.f32 %v299_v34, %v1483_v15 }
 0x3a2   :  { %1311 = vtanh.f32 %v301_v36  ;;  %v1076_v38 = vmul.f32 -1.442695, %v301_v36 }
 0x3a4   :  { %1313 = vpow2.f32 %v1076_v38 }
 0x3ac   :  { %v1312_v37 = vpop.eup %1311 }
 0x3ad   :  { %314 = vrot.lane.b32.xlu0 %v1312_v37, %s1394_s10 }
 0x3ae   :  { %v1314_v39 = vpop.eup %1313 }
 0x3af   :  { %v305_v40 = vadd.f32 1.0, %v1314_v39 }
 0x3b1   :  { %1315 = vrcp.f32 %v305_v40 }
 0x3bb   :  { %v1316_v41 = vpop.eup %1315 }
 0x3bc   :  { %v312_v45 = vmul.f32 %v1316_v41, %v310_v44 }
 0x41f   :  { %v315_v42 = vpop.permute.xlu0 %314 }
 0x420   :  { %v317_v43 = vmul.f32 %v1316_v41, %v315_v42 }
 0x422   :  { %319 = vrot.lane.b32.xlu1 %v317_v43, %s1395_s3 }
 0x494   :  { %v320_v46 = vpop.permute.xlu1 %319 }
 0x495   :  { %v322_v47 = vadd.f32 %v320_v46, %v312_v45 }
 0x497   :  { %1317 = vtanh.f32 %v322_v47  ;;  %v417_v0 = vrot.slane %v322_v47, 6 }
 0x4a1   :  { %v1318_v48 = vpop.eup %1317 }
 0x4a2   :  { %325 = vrot.lane.b32.xlu0 %v1318_v48, %s1394_s10 }
 0x514   :  { %v326_v49 = vpop.permute.xlu0 %325 }
 0x515   :  { %v328_v50 = vmul.f32 %v1316_v41, %v326_v49 }
 0x517   :  { %v330_v51 = vrot.slane %v328_v50, 2 }
 0x519   :  { %331 = vrot.lane.b32.xlu1 %v330_v51, %s1395_s3 }
 0x58b   :  { %v332_v52 = vpop.permute.xlu1 %331 }
 0x58c   :  { %1175 = vmatmul.mubr.msk.f32.vlgmr.msra.gmra.mrb[2].mxu1 %vm124_vm3, %v332_v52 }
 0x58d   :  { %1269 = vmatpush3.bf16.msra.mxu1 %v1442_v4  ;;  %1196 = vmatprep.mubr.msk.f32.mxu1 %vm1392_vm2, %v1393_v10 }
 0x58e   :  { %1270 = vmatprep.subr.bf16.mxu1 %v1391_v3 }
 0x591   :  { %1272 = vmatpush3.bf16.msra.mxu1 %v1457_v9 }
 0x592   :  { %1279 = vmatprep.subr.bf16.mxu1 %v1391_v3 }
 0x65f   :  { %v401_v53 = vpop.f32.mrb[2].mxu1 }
 0x660   :  { %v406_v54 = vrot.slane %v401_v53, 4  ;;  %v1176_v55 = vpop.f32.mrb[3].mxu1 }
 0x662   :  { %v408_v56 = vadd.f32 %v406_v54, %v1483_v15 }
 0x664   :  { %1319 = vtanh.f32 %v408_v56  ;;  %v1078_v58 = vmul.f32 -1.442695, %v408_v56 }
 0x666   :  { %1321 = vpow2.f32 %v1078_v58 }
 0x66e   :  { %v1320_v57 = vpop.eup %1319 }
 0x66f   :  { %421 = vrot.lane.b32.xlu0 %v1320_v57, %s1394_s10 }
 0x670   :  { %v1322_v59 = vpop.eup %1321 }
 0x671   :  { %v412_v60 = vadd.f32 1.0, %v1322_v59 }
 0x673   :  { %1323 = vrcp.f32 %v412_v60 }
 0x67d   :  { %v1324_v61 = vpop.eup %1323 }
 0x67e   :  { %v419_v1 = vmul.f32 %v1324_v61, %v417_v0 }
 0x6e1   :  { %v422_v62 = vpop.permute.xlu0 %421 }
 0x6e2   :  { %v424_v63 = vmul.f32 %v1324_v61, %v422_v62 }
 0x6e4   :  { %426 = vrot.lane.b32.xlu1 %v424_v63, %s1395_s3 }
 0x756   :  { %v427_v2 = vpop.permute.xlu1 %426 }
 0x757   :  { %v429_v5 = vadd.f32 %v427_v2, %v419_v1 }
 0x759   :  { %1325 = vtanh.f32 %v429_v5  ;;  %v524_v26 = vrot.slane %v429_v5, 6 }
 0x763   :  { %v1326_v6 = vpop.eup %1325 }
 0x764   :  { %432 = vrot.lane.b32.xlu0 %v1326_v6, %s1394_s10 }
 0x7d6   :  { %v433_v7 = vpop.permute.xlu0 %432 }
 0x7d7   :  { %v435_v8 = vmul.f32 %v1324_v61, %v433_v7 }
 0x7d9   :  { %v437_v11 = vrot.slane %v435_v8, 4 }
 0x7db   :  { %438 = vrot.lane.b32.xlu1 %v437_v11, %s1395_s3 }
 0x84d   :  { %v439_v12 = vpop.permute.xlu1 %438 }
 0x84e   :  { %1186 = vmatmul.mubr.msk.f32.vlgmr.msra.gmra.mrb[4].mxu0 %vm124_vm3, %v439_v12 }
 0x84f   :  { %1275 = vmatpush3.bf16.msra.mxu0 %v1442_v4  ;;  %1207 = vmatprep.mubr.msk.f32.mxu0 %vm1392_vm2, %v1393_v10 }
 0x850   :  { %1276 = vmatprep.subr.bf16.mxu0 %v1391_v3 }
 0x853   :  { %1278 = vmatpush3.bf16.msra.mxu0 %v1457_v9 }
 0x854   :  { %1285 = vmatprep.subr.bf16.mxu0 %v1391_v3 }
 0x921   :  { %v508_v14 = vpop.f32.mrb[4].mxu0 }
 0x922   :  { %v513_v16 = vrot.slane %v508_v14, 2  ;;  %v1187_v17 = vpop.f32.mrb[5].mxu0 }
 0x924   :  { %v515_v18 = vadd.f32 %v513_v16, %v1483_v15 }
 0x926   :  { %1327 = vtanh.f32 %v515_v18  ;;  %v1080_v20 = vmul.f32 -1.442695, %v515_v18 }
 0x928   :  { %1329 = vpow2.f32 %v1080_v20 }
 0x930   :  { %v1328_v19 = vpop.eup %1327 }
 0x931   :  { %528 = vrot.lane.b32.xlu0 %v1328_v19, %s1394_s10 }
 0x932   :  { %v1330_v21 = vpop.eup %1329 }
 0x933   :  { %v519_v22 = vadd.f32 1.0, %v1330_v21 }
 0x935   :  { %1331 = vrcp.f32 %v519_v22 }
 0x93f   :  { %v1332_v23 = vpop.eup %1331 }
 0x940   :  { %v526_v27 = vmul.f32 %v1332_v23, %v524_v26 }
 0x9a3   :  { %v529_v24 = vpop.permute.xlu0 %528 }
 0x9a4   :  { %v531_v25 = vmul.f32 %v1332_v23, %v529_v24 }
 0x9a6   :  { %533 = vrot.lane.b32.xlu1 %v531_v25, %s1395_s3 }
 0xa18   :  { %v534_v28 = vpop.permute.xlu1 %533 }
 0xa19   :  { %v536_v29 = vadd.f32 %v534_v28, %v526_v27 }
 0xa1b   :  { %1333 = vtanh.f32 %v536_v29  ;;  %v628_v44 = vrot.slane %v536_v29, 6 }
 0xa25   :  { %v1334_v15 = vpop.eup %1333 }
 0xa26   :  { %539 = vrot.lane.b32.xlu0 %v1334_v15, %s1394_s10 }
 0xa98   :  { %v540_v30 = vpop.permute.xlu0 %539 }
 0xa99   :  { %v542_v31 = vmul.f32 %v1332_v23, %v540_v30 }
 0xa9b   :  { %v544_v32 = vrot.slane %v542_v31, 6 }
 0xa9d   :  { %545 = vrot.lane.b32.xlu1 %v544_v32, %s1395_s3 }
 0xb0f   :  { %v546_v33 = vpop.permute.xlu1 %545 }
 0xb10   :  { %1197 = vmatmul.mubr.msk.f32.vlgmr.msra.gmra.mrb[4].mxu1 %vm124_vm3, %v546_v33 }
 0xb11   :  { %1281 = vmatpush3.bf16.msra.mxu1 %v1442_v4  ;;  %1218 = vmatprep.mubr.msk.f32.mxu1 %vm1392_vm2, %v1393_v10 }
 0xb12   :  { %1282 = vmatprep.subr.bf16.mxu1 %v1391_v3 }
 0xb15   :  { %1284 = vmatpush3.bf16.msra.mxu1 %v1457_v9 }
 0xb16   :  { %1291 = vmatprep.subr.bf16.mxu1 %v1391_v3 }
 0xbe3   :  { %v615_v34 = vpop.f32.mrb[4].mxu1 }
 0xbe4   :  { %v619_v35 = vadd.f32 %v615_v34, %v1481_v13  ;;  %v1198_v36 = vpop.f32.mrb[5].mxu1 }
 0xbe6   :  { %1335 = vtanh.f32 %v619_v35  ;;  %v1082_v38 = vmul.f32 -1.442695, %v619_v35 }
 0xbe8   :  { %1337 = vpow2.f32 %v1082_v38 }
 0xbf0   :  { %v1336_v37 = vpop.eup %1335 }
 0xbf1   :  { %632 = vrot.lane.b32.xlu0 %v1336_v37, %s1394_s10 }
 0xbf2   :  { %v1338_v39 = vpop.eup %1337 }
 0xbf3   :  { %v623_v40 = vadd.f32 1.0, %v1338_v39 }
 0xbf5   :  { %1339 = vrcp.f32 %v623_v40 }
 0xbff   :  { %v1340_v41 = vpop.eup %1339 }
 0xc00   :  { %v630_v45 = vmul.f32 %v1340_v41, %v628_v44 }
 0xc63   :  { %v633_v42 = vpop.permute.xlu0 %632 }
 0xc64   :  { %v635_v43 = vmul.f32 %v1340_v41, %v633_v42 }
 0xc66   :  { %637 = vrot.lane.b32.xlu1 %v635_v43, %s1395_s3 }
 0xcd8   :  { %v638_v46 = vpop.permute.xlu1 %637 }
 0xcd9   :  { %v640_v47 = vadd.f32 %v638_v46, %v630_v45  ;;  %v968_v45 = vld [vmem:[%s1596_s4 + $0x8] sm:$0xff]  ;;  %v969_v46 = vld [vmem:[%s1596_s4 + $0x10] sm:$0xff] }
 0xcdb   :  { %1341 = vtanh.f32 %v640_v47 }
 0xce5   :  { %v1342_v48 = vpop.eup %1341 }
 0xce6   :  { %643 = vrot.lane.b32.xlu0 %v1342_v48, %s1394_s10  ;;  %v970_v48 = vld [vmem:[%s1596_s4 + $0x18] sm:$0xff] }
 0xd58   :  { %v644_v49 = vpop.permute.xlu0 %643 }
 0xd59   :  { %v646_v50 = vmul.f32 %v1340_v41, %v644_v49  ;;  %v1295_v49 = vpack.c.bf16 %v970_v48, %v969_v46 }
 0xd5b   :  { %648 = vrot.lane.b32.xlu1 %v646_v50, %s1395_s3 }
 0xdcd   :  { %v649_v51 = vpop.permute.xlu1 %648 }
 0xdce   :  { %1208 = vmatmul.mubr.msk.f32.vlgmr.msra.gmra.mrb[6].mxu0 %vm124_vm3, %v649_v51 }
 0xdcf   :  { %1287 = vmatpush3.bf16.msra.mxu0 %v1442_v4  ;;  %1229 = vmatprep.mubr.msk.f32.mxu0 %vm1392_vm2, %v1393_v10 }
 0xdd0   :  { %1288 = vmatprep.subr.bf16.mxu0 %v1391_v3 }
 0xdd3   :  { %1290 = vmatpush3.bf16.msra.mxu0 %v1457_v9  ;;  %v734_v9 = vrot.slane %v640_v47, 6 }
 0xea1   :  { %v718_v52 = vpop.f32.mrb[6].mxu0 }
 0xea2   :  { %v723_v53 = vrot.slane %v718_v52, 6  ;;  %v1209_v54 = vpop.f32.mrb[7].mxu0 }
 0xea4   :  { %v725_v55 = vadd.f32 %v723_v53, %v1481_v13 }
 0xea6   :  { %1343 = vtanh.f32 %v725_v55  ;;  %v1084_v57 = vmul.f32 -1.442695, %v725_v55  ;;  %v1089_v55 = vld [vmem:[%s1597_s5] ss:$0 sm:$0xff] }
 0xea8   :  { %1345 = vpow2.f32 %v1084_v57 }
 0xeb0   :  { %v1344_v56 = vpop.eup %1343 }
 0xeb1   :  { %738 = vrot.lane.b32.xlu0 %v1344_v56, %s1394_s10 }
 0xeb2   :  { %v1346_v58 = vpop.eup %1345 }
 0xeb3   :  { %v729_v4 = vadd.f32 1.0, %v1346_v58 }
 0xeb5   :  { %1347 = vrcp.f32 %v729_v4 }
 0xebf   :  { %v1348_v59 = vpop.eup %1347 }
 0xec0   :  { %v736_v62 = vmul.f32 %v1348_v59, %v734_v9 }
 0xf23   :  { %v739_v60 = vpop.permute.xlu0 %738 }
 0xf24   :  { %v741_v61 = vmul.f32 %v1348_v59, %v739_v60 }
 0xf26   :  { %743 = vrot.lane.b32.xlu1 %v741_v61, %s1395_s3 }
 0xf98   :  { %v744_v63 = vpop.permute.xlu1 %743 }
 0xf99   :  { %v746_v0 = vadd.f32 %v744_v63, %v736_v62 }
 0xf9b   :  { %1349 = vtanh.f32 %v746_v0 }
 0xfa5   :  { %v1350_v1 = vpop.eup %1349 }
 0xfa6   :  { %749 = vrot.lane.b32.xlu0 %v1350_v1, %s1394_s10 }
0x1018   :  { %v750_v2 = vpop.permute.xlu0 %749 }
0x1019   :  { %v752_v5 = vmul.f32 %v1348_v59, %v750_v2 }
0x101b   :  { %v754_v6 = vrot.slane %v752_v5, 2 }
0x101d   :  { %755 = vrot.lane.b32.xlu1 %v754_v6, %s1395_s3 }
0x108f   :  { %v756_v7 = vpop.permute.xlu1 %755 }
0x1090   :  { %1219 = vmatmul.mubr.msk.f32.vlgmr.msra.gmra.mrb[6].mxu1 %vm124_vm3, %v756_v7 }
0x1091   :  { %1240 = vmatprep.mubr.msk.f32.mxu1 %vm1392_vm2, %v1393_v10  ;;  %v841_v10 = vrot.slane %v746_v0, 6 }
0x1163   :  { %v825_v8 = vpop.f32.mrb[6].mxu1 }
0x1164   :  { %v830_v11 = vrot.slane %v825_v8, 4  ;;  %v1220_v12 = vpop.f32.mrb[7].mxu1 }
0x1166   :  { %v832_v14 = vadd.f32 %v830_v11, %v1481_v13 }
0x1168   :  { %1351 = vtanh.f32 %v832_v14  ;;  %v1086_v17 = vmul.f32 -1.442695, %v832_v14 }
0x116a   :  { %1353 = vpow2.f32 %v1086_v17 }
0x1172   :  { %v1352_v16 = vpop.eup %1351 }
0x1173   :  { %845 = vrot.lane.b32.xlu0 %v1352_v16, %s1394_s10 }
0x1174   :  { %v1354_v18 = vpop.eup %1353 }
0x1175   :  { %v836_v19 = vadd.f32 1.0, %v1354_v18 }
0x1177   :  { %1355 = vrcp.f32 %v836_v19 }
0x1181   :  { %v1356_v20 = vpop.eup %1355 }
0x1182   :  { %v843_v23 = vmul.f32 %v1356_v20, %v841_v10 }
0x11e5   :  { %v846_v21 = vpop.permute.xlu0 %845 }
0x11e6   :  { %v848_v22 = vmul.f32 %v1356_v20, %v846_v21 }
0x11e8   :  { %850 = vrot.lane.b32.xlu1 %v848_v22, %s1395_s3 }
0x125a   :  { %v851_v24 = vpop.permute.xlu1 %850 }
0x125b   :  { %v853_v25 = vadd.f32 %v851_v24, %v843_v23 }
0x125d   :  { %1357 = vtanh.f32 %v853_v25  ;;  %v948_v41 = vrot.slane %v853_v25, 6 }
0x1267   :  { %v1358_v26 = vpop.eup %1357 }
0x1268   :  { %856 = vrot.lane.b32.xlu0 %v1358_v26, %s1394_s10 }
0x12da   :  { %v857_v27 = vpop.permute.xlu0 %856 }
0x12db   :  { %v859_v28 = vmul.f32 %v1356_v20, %v857_v27 }
0x12dd   :  { %v861_v29 = vrot.slane %v859_v28, 4 }
0x12df   :  { %862 = vrot.lane.b32.xlu1 %v861_v29, %s1395_s3 }
0x1351   :  { %v863_v15 = vpop.permute.xlu1 %862 }
0x1352   :  { %1230 = vmatmul.mubr.msk.f32.vlgmr.msra.gmra.mrb[8].mxu0 %vm124_vm3, %v863_v15 }
0x1425   :  { %v932_v30 = vpop.f32.mrb[8].mxu0 }
0x1426   :  { %v937_v31 = vrot.slane %v932_v30, 2  ;;  %v1231_v32 = vpop.f32.mrb[9].mxu0 }
0x1428   :  { %v939_v33 = vadd.f32 %v937_v31, %v1481_v13  ;;  %v967_v13 = vld [vmem:[%s1596_s4] sm:$0xff]  ;;  %s1396_s4 = smov [#allocation2]  }
0x1429   :  { %v1292_v47 = vpack.c.bf16 %v968_v45, %v967_v13  ;;  %s1062_s21 = sshll.u32 %s1396_s4, 4  ;;  %s1063_s21 = int_to_ptr.vmem [resolvable:$true] %s1062_s21 }
0x142a   :  { %1359 = vtanh.f32 %v939_v33  ;;  %v1088_v35 = vmul.f32 -1.442695, %v939_v33  ;;  %s1367_s22 = scalar_lea.vmem %s1063_s21, 32  ;;  %p1372_p1 = scmp.lt.s32.totalorder %s1063_s21, %s1063_s21 }
0x142b   :  { %1293 = vmatpush3.bf16.msra.mxu1 %v1292_v47  ;;  %p1368_p0 = scmp.ne.s32.totalorder %s1063_s21, %s1367_s22  ;;  %p1373_p2 = scmp.lt.s32.totalorder %s1367_s22, %s1367_s22 }
0x142c   :  { %1361 = vpow2.f32 %v1088_v35  ;;  %1294 = vmatprep.subr.bf16.mxu1 %v1391_v3 }
0x142d   :  { %p1374_p3 = por %p1373_p2, %p1372_p1 }
0x142f   :  { %1296 = vmatpush3.bf16.msra.mxu1 %v1295_v49  ;;  %p1375_p4 = pnand %p1374_p3, %p1368_p0 }
0x1434   :  { %v1360_v34 = vpop.eup %1359 }
0x1435   :  { %952 = vrot.lane.b32.xlu0 %v1360_v34, %s1394_s10 }
0x1436   :  { %v1362_v36 = vpop.eup %1361 }
0x1437   :  { %v943_v37 = vadd.f32 1.0, %v1362_v36 }
0x1439   :  { %1363 = vrcp.f32 %v943_v37 }
0x1443   :  { %v1364_v38 = vpop.eup %1363 }
0x1444   :  { %v950_v42 = vmul.f32 %v1364_v38, %v948_v41 }
0x14a7   :  { %v953_v39 = vpop.permute.xlu0 %952 }
0x14a8   :  { %v955_v40 = vmul.f32 %v1364_v38, %v953_v39 }
0x14aa   :  { %957 = vrot.lane.b32.xlu1 %v955_v40, %s1395_s3 }
0x151c   :  { %v958_v43 = vpop.permute.xlu1 %957 }
0x151d   :  { %v960_v44 = vadd.f32 %v958_v43, %v950_v42 }
0x151f   :  { %1365 = vtanh.f32 %v960_v44 }
0x1529   :  { %v1366_v50 = vpop.eup %1365 }
0x152a   :  { %963 = vrot.lane.b32.xlu0 %v1366_v50, %s1394_s10 }
0x159c   :  { %v964_v51 = vpop.permute.xlu0 %963 }
0x159d   :  { %v966_v52 = vmul.f32 %v1364_v38, %v964_v51 }
0x159f   :  { %v979_v53 = vrot.slane %v966_v52, 6 }
0x15a1   :  { %980 = vrot.lane.b32.xlu1 %v979_v53, %s1395_s3 }
0x1613   :  { %v981_v54 = vpop.permute.xlu1 %980 }
0x1614   :  { %1241 = vmatmul.mubr.msk.f32.vlgmr.msra.gmra.mrb[8].mxu1 %vm124_vm3, %v981_v54 }
0x16e7   :  { %v1050_v56 = vpop.f32.mrb[8].mxu1 }
0x16e8   :  { %v1051_v3 = vadd.f32 %v1089_v55, %v1050_v56  ;;  %v1242_v57 = vpop.f32.mrb[9].mxu1 }
0x16ea   :  { %1055 = vst.msk [vmem:[#allocation2] sm:$0x3] %vm1054_vm4, %v1051_v3 }
0x16eb   :  { %1378 = shalt.err (!%p1375_p4)
}
0x16ec   :  { %s1379_s25 = scalar_lea.hbm %s1598_s6, 32 }
0x16ed   :  { %p1380_p5 = scmp.ne.s32.totalorder %s1598_s6, %s1379_s25  ;;  %p1383_p6 = scmp.lt.u32.totalorder %s1379_s25, %s1598_s6 }
0x16ef   :  { %p1385_p7 = pnand %p1383_p6, %p1380_p5 }
0x16f1   :  { %1388 = shalt.err (!%p1385_p7)
}
0x16f2   :  { %1065 = dma.vmem_to_hbm [thread:$0]  %s1063_s21, 32, %s1598_s6, [#allocation3]  }
0x16f3   :  { %1389 = dma.done.wait [#allocation3], 32  }
0x16f4   :  { %1390 = vsyncadd [#allocation3], 4294967264 }
0x16f5   :  { %1069 = vsyncpa [#allocation3], 1 }

</bundles_post_ra>
